<compile_context>
chip_gen: v7x
topology: tpu7x:2x2x1
jax: 0.10.0
libtpu: 0.0.40
codegen_flags: <defaults>
</compile_context>

<pallas_src>
import functools

import jax
import jax.numpy as jnp
from jax.experimental import pallas as pl
from jax.experimental.pallas import tpu as pltpu


def _round_up(n, m):
    return ((n + m - 1) // m) * m


def _cdiv(a, b):
    return (a + b - 1) // b


def _vmem_capacity_bytes():
    try:
        return int(pltpu.get_tpu_info().vmem_capacity_bytes)
    except Exception:
        return 64 * 1024 * 1024  # conservative v7x per-TensorCore figure


def _single_buffered_spec(block_shape, index_map):
    # Constant-index (resident) blocks do not need double buffering.
    try:
        return pl.BlockSpec(block_shape, index_map, pipeline_mode=pl.Buffered(1))
    except TypeError:  # older BlockSpec signature without pipeline_mode
        return pl.BlockSpec(block_shape, index_map)


def patch_embed_kernel(p_ref, w_ref, b_ref, o_ref):
    # p_ref: (TN, K) bf16 patch rows | w_ref: (K, TE) bf16 flattened conv weight
    # b_ref: (1, TE) f32 bias        | o_ref: (TN, TE) f32
    y = jnp.dot(p_ref[...], w_ref[...], preferred_element_type=jnp.float32)
    y = y + b_ref[...]
    o_ref[...] = y.astype(o_ref.dtype)


@functools.partial(jax.jit, static_argnames=("patch_size", "tile_rows", "use_bf16"))
def patch_embedding(x, w, b, *, patch_size, tile_rows=2048, use_bf16=True):
    """x: (B, C, H, W); w: (E, C, P, P); b: (E,) -> (B, num_patches, E)."""
    B, C, H, W = x.shape
    E = w.shape[0]
    P = patch_size
    assert H % P == 0 and W % P == 0, (
        f"Image size must be divisible by patch size, got {(H, W)}, patch {P}")
    hp, wp = H // P, W // P
    K = C * P * P
    N = B * hp * wp
    out_dtype = x.dtype

    in_dtype = jnp.bfloat16 if use_bf16 else x.dtype
    in_isz = jnp.dtype(in_dtype).itemsize
    out_isz = jnp.dtype(out_dtype).itemsize

    # --- im2col: pure layout plumbing, done outside the kernel --------------
    # Patch vector ordering is (c, kh, kw), matching the conv weight flatten.
    # Cast first so the transpose + materialised (N, K) array move half bytes.
    # TODO(synk): fuse the patchify into the kernel (BlockSpec over x) to remove
    # this extra HBM pass entirely in the small-K (C=3, P<=8) regime.
    xs = x.astype(in_dtype)
    patches = xs.reshape(B, C, hp, P, wp, P).transpose(0, 2, 4, 1, 3, 5).reshape(N, K)
    w2d = w.reshape(E, K).T.astype(in_dtype)     # (K, E): lane-dense output along E
    b2d = b.reshape(1, E).astype(jnp.float32)

    # --- VMEM budget (per TensorCore) ---------------------------------------
    capacity = _vmem_capacity_bytes()
    usable = max(32 * 1024 * 1024, min(capacity - (8 << 20), 100 * 1024 * 1024))

    # --- E (output-column) tiling only if resident weight is too big --------
    TE = E
    while (E % 128 == 0 and TE % 2 == 0 and (TE // 2) % 128 == 0
           and _round_up(K, 8) * _round_up(TE, 128) * in_isz > usable // 3):
        TE //= 2
    e_tiles = E // TE
    K_lanes = _round_up(K, 128)
    TE_lanes = _round_up(TE, 128)
    resident_w_bytes = _round_up(K, 8) * TE_lanes * in_isz
    single_buffer_w = (e_tiles == 1) and (resident_w_bytes > (8 << 20))
    w_bufs = 1 if single_buffer_w else 2

    # --- row tiling: >= 8 grid steps (TC sharding + pipelining), <=~3% pad ---
    fixed = w_bufs * (resident_w_bytes + 8 * TE_lanes * 4) + (2 << 20)
    per_row = 2 * K_lanes * in_isz + 2 * TE_lanes * out_isz   # double-buffered in/out
    avail = max(usable - fixed, 8 * per_row)
    tn_cap = max(8, (avail // per_row) // 8 * 8)

    MIN_TILES = 8
    max_tn = min(tile_rows, tn_cap, _round_up(N, 8))
    TN = max(8, min(max_tn, _round_up(_cdiv(N, MIN_TILES), 8)))
    while TN > 8 and (_round_up(N, TN) - N) * 32 > _round_up(N, TN):
        TN -= 8

    N_pad = _round_up(N, TN)
    if N_pad != N:
        patches = jnp.pad(patches, ((0, N_pad - N), (0, 0)))
    grid = (N_pad // TN, e_tiles)

    vmem_need = (2 * TN * K_lanes * in_isz + 2 * TN * TE_lanes * out_isz
                 + w_bufs * (resident_w_bytes + 8 * TE_lanes * 4) + (2 << 20))
    vmem_limit = int(min(max(vmem_need, 32 * 1024 * 1024), usable))

    if single_buffer_w:
        w_spec = _single_buffered_spec((K, TE), lambda i, j: (0, j))
        b_spec = _single_buffered_spec((1, TE), lambda i, j: (0, j))
    else:
        w_spec = pl.BlockSpec((K, TE), lambda i, j: (0, j))
        b_spec = pl.BlockSpec((1, TE), lambda i, j: (0, j))

    out2d = pl.pallas_call(
        patch_embed_kernel,
        out_shape=jax.ShapeDtypeStruct((N_pad, E), out_dtype),
        grid=grid,
        in_specs=[
            pl.BlockSpec((TN, K), lambda i, j: (i, 0)),   # patch rows: tiled over N
            w_spec,                                       # weight: resident / E-tiled
            b_spec,                                       # bias
        ],
        out_specs=pl.BlockSpec((TN, TE), lambda i, j: (i, j)),
        compiler_params=pltpu.CompilerParams(
            dimension_semantics=("parallel", "parallel"),  # shard tiles across TCs
            vmem_limit_bytes=vmem_limit,
        ),
        cost_estimate=pl.CostEstimate(
            flops=2 * N_pad * K * E,
            transcendentals=0,
            bytes_accessed=in_isz * (N_pad * K + K * E) + out_isz * N_pad * E,
        ),
    )(patches, w2d, b2d)

    return out2d[:N].reshape(B, hp * wp, E)


def reference(x, w, b, patch_size):
    # Independent reference: the actual strided conv + flatten + permute.
    y = jax.lax.conv_general_dilated(
        x, w, window_strides=(patch_size, patch_size), padding="VALID",
        dimension_numbers=("NCHW", "OIHW", "NCHW"),
        precision=jax.lax.Precision.HIGHEST)
    y = y + b.reshape(1, -1, 1, 1)
    B, E, hp, wp = y.shape
    return y.reshape(B, E, hp * wp).transpose(0, 2, 1)


if __name__ == "__main__":
    batch, in_channels, image_size = 2, 3, 16
    patch_size, embedding_dim = 4, 128

    key = jax.random.PRNGKey(0)
    kx, kw, kb = jax.random.split(key, 3)
    x = jax.random.normal(kx, (batch, in_channels, image_size, image_size),
                          dtype=jnp.float32)
    w = jax.random.normal(kw, (embedding_dim, in_channels, patch_size, patch_size),
                          dtype=jnp.float32) * 0.02
    b = 0.01 * jax.random.normal(kb, (embedding_dim,), dtype=jnp.float32)

    out = patch_embedding(x, w, b, patch_size=patch_size)
    jax.block_until_ready(out)

    # Reference conv run on the same bf16-rounded operands (fp32 accumulation),
    # matching the kernel's bf16-operand / fp32-accumulate numerics.
    xq = x.astype(jnp.bfloat16).astype(jnp.float32)
    wq = w.astype(jnp.bfloat16).astype(jnp.float32)
    ref = reference(xq, wq, b, patch_size)

    num_patches = (image_size // patch_size) ** 2
    assert out.shape == (batch, num_patches, embedding_dim)
    assert jnp.allclose(out, ref, atol=1e-2, rtol=1e-2), float(
        jnp.max(jnp.abs(out - ref)))
    print("KERNEL_OK")
</pallas_src>

<mosaic_0001>
module attributes {stable_mosaic.version = 11 : i64} {
  func.func @patch_embed_kernel(%arg0: i32, %arg1: i32, %arg2: memref<8x48xbf16, #tpu.memory_space<vmem>>, %arg3: memref<48x128xbf16, #tpu.memory_space<vmem>>, %arg4: memref<1x128xf32, #tpu.memory_space<vmem>>, %arg5: memref<8x128xf32, #tpu.memory_space<vmem>>) attributes {dimension_semantics = [#tpu.dimension_semantics<parallel>, #tpu.dimension_semantics<parallel>], iteration_bounds = array<i64: 4, 1>, scalar_prefetch = 0 : i64, scratch_operands = 0 : i64, tpu.core_type = #tpu.core_type<tc>, window_params = [{transform_indices = @transform_0, window_bounds = array<i64: 8, 48>}, {transform_indices = @transform_1, window_bounds = array<i64: 48, 128>}, {transform_indices = @transform_2, window_bounds = array<i64: 1, 128>}, {transform_indices = @transform_3, window_bounds = array<i64: 8, 128>}]} {
    %c0 = arith.constant 0 : index
    %c0_0 = arith.constant 0 : index
    %0 = vector.load %arg2[%c0, %c0_0] : memref<8x48xbf16, #tpu.memory_space<vmem>>, vector<8x48xbf16>
    %c0_1 = arith.constant 0 : index
    %c0_2 = arith.constant 0 : index
    %1 = vector.load %arg3[%c0_1, %c0_2] : memref<48x128xbf16, #tpu.memory_space<vmem>>, vector<48x128xbf16>
    %cst = arith.constant dense<0.000000e+00> : vector<8x128xf32>
    %2 = tpu.matmul %0, %1, %cst {dimension_numbers = #tpu.dot_dimension_numbers<[1], [0], [0], [1], [0, 0, 1, 1], [], []>} : vector<8x48xbf16>, vector<48x128xbf16>, vector<8x128xf32> -> vector<8x128xf32>
    %c0_3 = arith.constant 0 : index
    %c0_4 = arith.constant 0 : index
    %3 = vector.load %arg4[%c0_3, %c0_4] : memref<1x128xf32, #tpu.memory_space<vmem>>, vector<1x128xf32>
    %4 = vector.broadcast %3 : vector<1x128xf32> to vector<8x128xf32>
    %5 = arith.addf %2, %4 : vector<8x128xf32>
    %c0_5 = arith.constant 0 : index
    %c0_6 = arith.constant 0 : index
    %6 = vector.load %arg5[%c0_5, %c0_6] : memref<8x128xf32, #tpu.memory_space<vmem>>, vector<8x128xf32>
    tpu.vector_store %arg5[%c0_5, %c0_6], %5 {strides = array<i32>} : memref<8x128xf32, #tpu.memory_space<vmem>>, vector<8x128xf32>,
    return
  }
  func.func @transform_0(%arg0: i32, %arg1: i32) -> (i32, i32) {
    %c0_i32 = arith.constant 0 : i32
    %c0_i32_0 = arith.constant 0 : i32
    return %arg0, %c0_i32 : i32, i32
  }
  func.func @transform_1(%arg0: i32, %arg1: i32) -> (i32, i32) {
    %c0_i32 = arith.constant 0 : i32
    %c0_i32_0 = arith.constant 0 : i32
    return %c0_i32, %arg1 : i32, i32
  }
  func.func @transform_2(%arg0: i32, %arg1: i32) -> (i32, i32) {
    %c0_i32 = arith.constant 0 : i32
    %c0_i32_0 = arith.constant 0 : i32
    return %c0_i32, %arg1 : i32, i32
  }
  func.func @transform_3(%arg0: i32, %arg1: i32) -> (i32, i32) {
    %c0_i32 = arith.constant 0 : i32
    return %arg0, %arg1 : i32, i32
  }
}

</mosaic_0001>

<bundles_post_ra>
// kernel: patch_embedding.1
= control target key start
LH: loop header
LB: loop body
LE: loop exit
PB: predicated region body
PF: predicated region fallthrough
CT: control target
= control target key end

     0   :  { %8 = vsyncpa [#allocation3], 0  ;;  %s718_s0 = inlined_call_operand.vmem [shape: bf16[32,48], index: 0, kind: input, shape index: {}]   ;;  %s719_s1 = inlined_call_operand.vmem [shape: bf16[48,128], index: 1, kind: input, shape index: {}]   ;;  %s720_s2 = inlined_call_operand.vmem [shape: f32[1,128], index: 2, kind: input, shape index: {}]   ;;  %s721_s3 = inlined_call_operand.hbm [shape: f32[32,128], index: 3, kind: output, shape index: {}]  }
   0x1   :  { %10 = vsyncpa [#allocation3 + $0x1], 0  ;;  %s594_s12 = smov 0   ;;  %s596_s13 = smov 0  }
   0x2   :  { %s598_s14 = smov 0   ;;  %s600_s15 = smov 0  }
   0x3   :  { %s602_s16 = smov 0   ;;  %s604_s17 = smov 0  }
   0x4 LB: > { %s399_s18 = sadd.s32 4294967295, %s569_s17   ;;  %s400_s19 = sadd.s32 4294967294, %s569_s17   ;;  %s569_s17 = sphi %s604_s17, %s16_s17   ;;  %s565_s16 = sphi %s602_s16, %s728_s16   ;;  %s561_s15 = sphi %s600_s15, %s727_s15   ;;  %s557_s14 = sphi %s598_s14, %s726_s14   ;;  %s553_s13 = sphi %s596_s13, %s725_s13   ;;  %s549_s12 = sphi %s594_s12, %s724_s12  }
   0x5   : > { %s28_s20 = sadd.s32 1, %s565_s16  ;;  %s115_s21 = sadd.s32 1, %s557_s14 }
   0x6   : > { %p30_p0 = scmp.ge.s32.totalorder %s28_s20, 4  ;;  %p125_p1 = scmp.ne.s32.totalorder %s557_s14, %s553_s13 }
   0x7   : > { %p126_p2 = scmp.eq.s32.totalorder %s399_s18, 3  ;;  %p131_p3 = scmp.ne.s32.totalorder %s553_s13, %s549_s12 }
   0x8   : > { %s730_s20 = smov (%p30_p0, %s28_s20), 0  ;;  %p132_p5 = scmp.eq.s32.totalorder %s400_s19, 3 }
   0x9   : > { %p634_p4 = por %p126_p2, %p125_p1  ;;  %s110_s23 = ssub.s32 %s565_s16, %s730_s20 }
   0xa   : > { %p405_p6 = scmp.ge.s32.totalorder %s569_s17, 1  ;;  %p113_p7 = scmp.eq.s32.totalorder %s110_s23, 0 }
   0xb   : > { %p641_p8 = por %p132_p5, %p131_p3  ;;  %p170_p9 = scmp.lt.s32.totalorder %s569_s17, 5 }
   0xc   : > { %s647_s25 = scalar_select %p113_p7, %s557_s14, %s115_s21  }
   0xd   : > { %p171_p10 = pnand %p405_p6, %p170_p9 }
   0xe   : > { %v488_v0 = vld [vmem:[%s719_s1] sm:$0xff] (!%p171_p10)   ;;  %v571_v1 = vmov (!%p171_p10), 0.0   ;;  %v489_v2 = vld [vmem:[%s719_s1 + $0x8] sm:$0xff] (!%p171_p10)   ;;  %vm572_vm0 = vmmov (!%p171_p10), 0   ;;  %p200_p11 = scmp.lt.s32.totalorder (!%p171_p10), %s561_s15, 3  ;;  %v490_v3 = vld [vmem:[%s719_s1 + $0x10] sm:$0xff] (!%p171_p10)  }
   0xf   : > { %174 = sbr.rel (%p171_p10) target bundleno = 255 (0xff), region = 32  ;;  %421 = vmatprep.subr.bf16.mxu0 (!%p171_p10), %v571_v1  ;;  %427 = vmatprep.mubr.msk.bf16.mxu0 (!%p171_p10), %vm572_vm0, %v571_v1  ;;  %vm244_vm1 = vcmask (!%p171_p10), 392192   ;;  %s197_s10 = sand.u32 (!%p171_p10), 1, %s553_s13   ;;  %v408_v5 = vld [vmem:[%s720_s2] ss:$0 sm:$0xff] (!%p171_p10) }
  0x10   : > { %422 = vmatpush3.bf16.msra.mxu0 (!%p171_p10), %v488_v0  ;;  %s406_s11 = sshll.u32 (!%p171_p10), %s197_s10, 3  ;;  %s414_s21 = sshll.u32 (!%p171_p10), %s561_s15, 7 }
  0x11   : > { %423 = vmatprep.subr.bf16.mxu0 (!%p171_p10), %v571_v1  ;;  %s199_s23 = scalar_lea.vmem (!%p171_p10), [#allocation2], %s406_s11  ;;  %s671_s29 = scalar_lea.hbm (!%p171_p10), %s721_s3, %s414_s21 }
  0x12   : > { %s304_s26 = sshll.u32 (!%p171_p10), %s199_s23, 4  ;;  %s573_s4 = smov (!%p171_p10), [#allocation2]   ;;  %s673_s26 = int_to_ptr.vmem [resolvable:$true] %s304_s26 }
  0x13   : > { %s495_s5 = sshll.u32 (!%p171_p10), %s573_s4, 4  ;;  %s496_s5 = int_to_ptr.vmem [resolvable:$false] %s495_s5 }
  0x14   : > { %424 = vmatpush3.bf16.msra.mxu0 (!%p171_p10), %v489_v2  ;;  %p498_p1 = scmp.lt.s32.totalorder (!%p171_p10), %s673_s26, %s496_s5 }
  0x15   : > { %425 = vmatprep.subr.bf16.mxu0 (!%p171_p10), %v571_v1 }
  0x16   : > { %s201_s30 = scalar_select %p200_p11, %s561_s15, 3 }
  0x17   : > { %s491_s15 = scalar_lea.vmem %s673_s26, 128 }
  0x18   : > { %s407_s6 = sshll.u32 %s201_s30, 2  ;;  %426 = vmatpush3.bf16.msra.mxu0 %v490_v3  ;;  %s290_s30 = scalar_lea.sflag [#allocation3], %s197_s10 }
  0x19   : > { %s203_s9 = scalar_lea.vmem %s718_s0, %s407_s6  ;;  %p492_p12 = scmp.ne.s32.totalorder %s673_s26, %s491_s15 }
  0x1a   : > { %v212_v4 = vld [vmem:[%s203_s9] sm:$0xf]  ;;  %s497_s6 = scalar_lea.vmem %s496_s5, 256 }
  0x1b   : > { %428 = vmatmul.mubr.msk.bf16.vlgmr.msra.gmra.mrb[0].mxu0 %vm244_vm1, %v212_v4  ;;  %p493_p13 = pnand %p492_p12, %p634_p4  ;;  %p499_p2 = scmp.lt.s32.totalorder %s497_s6, %s491_s15 }
  0x1d   : > { %p494_p0 = pneg %p493_p13  ;;  %p500_p3 = por %p499_p2, %p498_p1 }
  0x1f   : > { %p501_p5 = pnand %p500_p3, %p494_p0 }
  0xee   : > { %v282_v6 = vpop.f32.mrb[0].mxu0 }
  0xef   : > { %v283_v7 = vadd.f32 %v408_v5, %v282_v6  ;;  %v429_v8 = vpop.f32.mrb[1].mxu0 }
  0xf0   : > { %v285_v9 = vpop.f32.mrb[2].mxu0 }
  0xf1   : > { %288 = vst [vmem:[%s199_s23] sm:$0xff] %v283_v7  ;;  %v430_v10 = vpop.f32.mrb[3].mxu0 }
  0xf2   : > { %504 = shalt.err (!%p501_p5)
}
  0xf3   : > { %s505_s7 = scalar_lea.hbm %s671_s29, 128  ;;  %s509_s10 = scalar_lea.hbm %s721_s3, 512 }
  0xf4   : > { %p506_p6 = scmp.ne.s32.totalorder %s671_s29, %s505_s7  ;;  %p510_p10 = scmp.lt.u32.totalorder %s671_s29, %s721_s3 }
  0xf5   : > { %p511_p11 = scmp.lt.u32.totalorder %s509_s10, %s505_s7  ;;  %p513_p13 = scmp.lt.u32.totalorder %s505_s7, %s671_s29 }
  0xf6   : > { %p507_p7 = pnand %p506_p6, %p634_p4 }
  0xf7   : > { %p512_p12 = por %p511_p11, %p510_p10 }
  0xf8   : > { %p508_p9 = pneg %p507_p7 }
  0xf9   : > { %p514_p0 = por %p513_p13, %p512_p12 }
  0xfb   : > { %p515_p1 = pnand %p514_p0, %p508_p9 }
  0xfd   : > { %518 = shalt.err (!%p515_p1)
}
  0xfe   : > { %431 = dma.vmem_to_hbm [thread:$0]  (%p634_p4), %s673_s26, 128, %s671_s29, %s290_s30  }
  0xff PF: > { %p437_p2 = scmp.ge.s32.totalorder %s569_s17, 2  ;;  %s316_s19 = sand.u32 1, %s549_s12  }
 0x100   : > { %s317_s21 = scalar_lea.sflag [#allocation3], %s316_s19 }
 0x101   : > { %p434_p3 = pnand %p437_p2, %p641_p8 }
 0x103   : > { %544 = dma.done.wait (!%p434_p3), %s317_s21, 128  }
 0x104   : > { %546 = vsyncadd (!%p434_p3), %s317_s21, 4294967168  ;;  %s16_s17 = sadd.s32 1, %s569_s17   ;;  %s724_s12 = smov %s553_s13 }
 0x105   : > { %p13_p5 = scmp.ge.s32.totalorder %s16_s17, 6   ;;  %s725_s13 = smov %s557_s14 }
 0x106   : > { %s726_s14 = smov %s647_s25  ;;  %s727_s15 = smov %s565_s16 }
 0x107   : > { %s728_s16 = smov %s730_s20  ;;  %15 = sbr.rel (!%p13_p5) target bundleno = 4 (0x4), region = 73 }
 0x10e   :  { %322 = vsyncpa [#allocation3], 1 }
 0x10f   :  { %324 = vsyncpa [#allocation3 + $0x1], 1 }

</bundles_post_ra>
